<compile_context>
chip_gen: v7x
topology: tpu7x:2x2x1
jax: 0.10.0
libtpu: 0.0.40
codegen_flags: <defaults>
</compile_context>

<pallas_src>
import jax
import jax.numpy as jnp
import numpy as np
from jax import lax
from jax.experimental import pallas as pl
from jax.experimental.pallas import tpu as pltpu

# Small, module-consistent problem sizes.
B = 2                 # batch
N = 8                 # sequence length (tokens)
DIM = 32              # model dim
HEADS = 4
DIM_HEAD = 8
INNER = HEADS * DIM_HEAD          # 32
SCALE = DIM_HEAD ** (-0.5)

BN = B * N                        # rows after collapsing batch onto sublanes
T = HEADS * BN                    # packed query rows: t = h*BN + b*N + n
NEG_INF = -1e30


def attention_kernel(x_ref, wq_ref, wk_ref, wv_ref, wo_ref, bias_ref,
                     hmask_ref, bmask_ref, o_ref):
    """Single-step fused MHA over all batches / heads.

    x_ref     : (BN, DIM)      bf16
    wq/wk/wv  : (DIM, INNER)   bf16   (softmax scale folded into wq)
    wo_ref    : (INNER, DIM)   bf16
    bias_ref  : (1, DIM)       f32
    hmask_ref : (T, INNER)     f32    1.0 where lane-head == row-head, else 0.0
    bmask_ref : (T, BN)        f32    additive 0 / -1e30 same-batch mask
    o_ref     : (BN, DIM)      f32
    """
    x = x_ref[...]                                            # (BN, DIM) bf16

    # Full-width projections: one matmul each (scale already folded into wq).
    q = jnp.dot(x, wq_ref[...], preferred_element_type=jnp.float32)  # (BN, INNER)
    k = jnp.dot(x, wk_ref[...], preferred_element_type=jnp.float32)
    v = jnp.dot(x, wv_ref[...], preferred_element_type=jnp.float32)

    # Pack heads on the sublane axis for Q only: packed row t = h*BN + b*N + n
    # keeps just head-h lanes (multiplicative mask), so Q_rep @ K^T contracts
    # over a single head's lanes per row while K and V stay un-replicated.
    hmask = hmask_ref[...]                                    # (T, INNER) f32
    q_rep = jnp.concatenate([q] * HEADS, axis=0) * hmask      # (T, INNER) f32

    dots = lax.dot_general(
        q_rep.astype(jnp.bfloat16), k.astype(jnp.bfloat16),
        (((1,), (1,)), ((), ())),                             # q_rep @ k^T
        preferred_element_type=jnp.float32)                   # (T, BN)
    dots = dots + bmask_ref[...]                              # batch separation

    # Numerically-stable softmax in f32 (masked entries underflow to 0).
    m = jnp.max(dots, axis=-1, keepdims=True)
    p = jnp.exp(dots - m)
    attn = p * pl.reciprocal(jnp.sum(p, axis=-1, keepdims=True), approx=True)

    # PV against the un-replicated V; keep only each row's own head lanes.
    pv = jnp.dot(attn.astype(jnp.bfloat16), v.astype(jnp.bfloat16),
                 preferred_element_type=jnp.float32)          # (T, INNER)
    pv = pv * hmask

    # Output projection in ONE full-width matmul: foreign-head rows of wout
    # multiply exact zeros in pv, so each packed row is its head's contribution.
    proj = jnp.dot(pv.astype(jnp.bfloat16), wo_ref[...],
                   preferred_element_type=jnp.float32)        # (T, DIM)

    # Per-head combine = sum of H sublane row-blocks; bias folded into the
    # first add.  (DIM=32 fills 32/128 lanes; at this model size the (BN, DIM)
    # slab is already the densest output layout available.)
    acc = proj[0:BN, :] + bias_ref[...]
    for h in range(1, HEADS):
        acc = acc + proj[h * BN:(h + 1) * BN, :]
    o_ref[...] = acc.astype(o_ref.dtype)


@jax.jit
def attention_forward(x, wqkv_t, wout_t, bout):
    b, n, d = x.shape
    bn = b * n
    t = HEADS * bn

    # ---- trace-time weight restructuring (outside the kernel) ----
    wq = (wqkv_t[:, :INNER] * SCALE).astype(jnp.bfloat16)      # fold softmax scale
    wk = wqkv_t[:, INNER:2 * INNER].astype(jnp.bfloat16)
    wv = wqkv_t[:, 2 * INNER:3 * INNER].astype(jnp.bfloat16)
    wo = wout_t.astype(jnp.bfloat16)
    bias = bout.astype(jnp.float32)

    x_flat = x.reshape(bn, d).astype(jnp.bfloat16)

    # Shape-only masks (no data dependence -> XLA constant-folds them).
    row = jnp.arange(t, dtype=jnp.int32)
    col = jnp.arange(bn, dtype=jnp.int32)
    lane = jnp.arange(INNER, dtype=jnp.int32)
    # Multiplicative head-lane mask: packed row t belongs to head t // bn.
    hmask = ((row[:, None] // bn) == (lane[None, :] // DIM_HEAD)).astype(jnp.float32)
    # Additive same-batch mask: row batch = (t % bn) // n, col batch = col // n.
    bmask = jnp.where(((row[:, None] % bn) // n) == (col[None, :] // n),
                      0.0, NEG_INF).astype(jnp.float32)

    out_flat = pl.pallas_call(
        attention_kernel,
        out_shape=jax.ShapeDtypeStruct((bn, d), jnp.float32),
        grid=(1,),
        in_specs=[
            pl.BlockSpec((bn, d), lambda i: (0, 0)),
            pl.BlockSpec((d, INNER), lambda i: (0, 0)),
            pl.BlockSpec((d, INNER), lambda i: (0, 0)),
            pl.BlockSpec((d, INNER), lambda i: (0, 0)),
            pl.BlockSpec((INNER, d), lambda i: (0, 0)),
            pl.BlockSpec((1, d), lambda i: (0, 0)),
            pl.BlockSpec((t, INNER), lambda i: (0, 0)),
            pl.BlockSpec((t, bn), lambda i: (0, 0)),
        ],
        out_specs=pl.BlockSpec((bn, d), lambda i: (0, 0)),
        compiler_params=pltpu.CompilerParams(
            dimension_semantics=("arbitrary",)),
    )(x_flat, wq, wk, wv, wo, bias, hmask, bmask)
    return out_flat.reshape(b, n, d)


def reference_forward(x, wqkv_t, wout_t, bout):
    # Pure-JAX f32 reference replicating the PyTorch forward.
    qkv = x @ wqkv_t                                      # (B, N, 3*INNER)
    q, k, v = jnp.split(qkv, 3, axis=-1)

    def to_heads(tns):
        bb, nn, _ = tns.shape
        return tns.reshape(bb, nn, HEADS, DIM_HEAD).transpose(0, 2, 1, 3)

    q, k, v = map(to_heads, (q, k, v))                    # (B, H, N, Dh)
    dots = jnp.einsum('bhid,bhjd->bhij', q, k) * SCALE
    attn = jax.nn.softmax(dots, axis=-1)
    out = jnp.einsum('bhij,bhjd->bhid', attn, v)
    out = out.transpose(0, 2, 1, 3).reshape(x.shape[0], x.shape[1], INNER)
    return out @ wout_t + bout


if __name__ == "__main__":
    key = jax.random.PRNGKey(0)
    kx, kqkv, kwo, kbo = jax.random.split(key, 4)

    x = jax.random.normal(kx, (B, N, DIM), dtype=jnp.float32)

    # nn.Linear-shaped params, pre-transposed:
    # to_qkv: Linear(DIM, 3*INNER, bias=False) -> pass W^T (DIM, 3*INNER).
    wqkv_t = jax.random.normal(kqkv, (DIM, 3 * INNER), dtype=jnp.float32) * 0.05
    # to_out[0]: Linear(INNER, DIM) -> pass W^T (INNER, DIM) and bias (1, DIM).
    wout_t = jax.random.normal(kwo, (INNER, DIM), dtype=jnp.float32) * 0.05
    bout = jax.random.normal(kbo, (1, DIM), dtype=jnp.float32) * 0.05

    out = attention_forward(x, wqkv_t, wout_t, bout)
    out = jax.block_until_ready(out)

    ref = reference_forward(x, wqkv_t, wout_t, bout[0])
    # bf16 matmul operands + approx reciprocal -> relaxed tolerance vs f32 ref.
    np.testing.assert_allclose(np.asarray(out), np.asarray(ref),
                               rtol=2e-2, atol=2e-2)
    print("KERNEL_OK")
</pallas_src>

<mosaic_0001>
module attributes {stable_mosaic.version = 11 : i64} {
  func.func @attention_kernel(%arg0: i32, %arg1: memref<16x32xbf16, #tpu.memory_space<vmem>>, %arg2: memref<32x32xbf16, #tpu.memory_space<vmem>>, %arg3: memref<32x32xbf16, #tpu.memory_space<vmem>>, %arg4: memref<32x32xbf16, #tpu.memory_space<vmem>>, %arg5: memref<32x32xbf16, #tpu.memory_space<vmem>>, %arg6: memref<1x32xf32, #tpu.memory_space<vmem>>, %arg7: memref<64x32xf32, #tpu.memory_space<vmem>>, %arg8: memref<64x16xf32, #tpu.memory_space<vmem>>, %arg9: memref<16x32xf32, #tpu.memory_space<vmem>>) attributes {dimension_semantics = [#tpu.dimension_semantics<arbitrary>], iteration_bounds = array<i64: 1>, scalar_prefetch = 0 : i64, scratch_operands = 0 : i64, tpu.core_type = #tpu.core_type<tc>, window_params = [{pipeline_mode = #tpu.pipeline_mode<synchronous>, transform_indices = @transform_0, window_bounds = array<i64: 16, 32>}, {pipeline_mode = #tpu.pipeline_mode<synchronous>, transform_indices = @transform_1, window_bounds = array<i64: 32, 32>}, {pipeline_mode = #tpu.pipeline_mode<synchronous>, transform_indices = @transform_2, window_bounds = array<i64: 32, 32>}, {pipeline_mode = #tpu.pipeline_mode<synchronous>, transform_indices = @transform_3, window_bounds = array<i64: 32, 32>}, {pipeline_mode = #tpu.pipeline_mode<synchronous>, transform_indices = @transform_4, window_bounds = array<i64: 32, 32>}, {pipeline_mode = #tpu.pipeline_mode<synchronous>, transform_indices = @transform_5, window_bounds = array<i64: 1, 32>}, {pipeline_mode = #tpu.pipeline_mode<synchronous>, transform_indices = @transform_6, window_bounds = array<i64: 64, 32>}, {pipeline_mode = #tpu.pipeline_mode<synchronous>, transform_indices = @transform_7, window_bounds = array<i64: 64, 16>}, {pipeline_mode = #tpu.pipeline_mode<synchronous>, transform_indices = @transform_8, window_bounds = array<i64: 16, 32>}]} {
    %c0 = arith.constant 0 : index
    %c0_0 = arith.constant 0 : index
    %0 = vector.load %arg1[%c0, %c0_0] : memref<16x32xbf16, #tpu.memory_space<vmem>>, vector<16x32xbf16>
    %c0_1 = arith.constant 0 : index
    %c0_2 = arith.constant 0 : index
    %1 = vector.load %arg2[%c0_1, %c0_2] : memref<32x32xbf16, #tpu.memory_space<vmem>>, vector<32x32xbf16>
    %cst = arith.constant dense<0.000000e+00> : vector<16x32xf32>
    %2 = tpu.matmul %0, %1, %cst {dimension_numbers = #tpu.dot_dimension_numbers<[1], [0], [0], [1], [0, 0, 1, 1], [], []>} : vector<16x32xbf16>, vector<32x32xbf16>, vector<16x32xf32> -> vector<16x32xf32>
    %c0_3 = arith.constant 0 : index
    %c0_4 = arith.constant 0 : index
    %3 = vector.load %arg3[%c0_3, %c0_4] : memref<32x32xbf16, #tpu.memory_space<vmem>>, vector<32x32xbf16>
    %cst_5 = arith.constant dense<0.000000e+00> : vector<16x32xf32>
    %4 = tpu.matmul %0, %3, %cst_5 {dimension_numbers = #tpu.dot_dimension_numbers<[1], [0], [0], [1], [0, 0, 1, 1], [], []>} : vector<16x32xbf16>, vector<32x32xbf16>, vector<16x32xf32> -> vector<16x32xf32>
    %c0_6 = arith.constant 0 : index
    %c0_7 = arith.constant 0 : index
    %5 = vector.load %arg4[%c0_6, %c0_7] : memref<32x32xbf16, #tpu.memory_space<vmem>>, vector<32x32xbf16>
    %cst_8 = arith.constant dense<0.000000e+00> : vector<16x32xf32>
    %6 = tpu.matmul %0, %5, %cst_8 {dimension_numbers = #tpu.dot_dimension_numbers<[1], [0], [0], [1], [0, 0, 1, 1], [], []>} : vector<16x32xbf16>, vector<32x32xbf16>, vector<16x32xf32> -> vector<16x32xf32>
    %c0_9 = arith.constant 0 : index
    %c0_10 = arith.constant 0 : index
    %7 = vector.load %arg7[%c0_9, %c0_10] : memref<64x32xf32, #tpu.memory_space<vmem>>, vector<64x32xf32>
    %8 = tpu.concatenate %2, %2, %2, %2 in 0 : vector<16x32xf32>, vector<16x32xf32>, vector<16x32xf32>, vector<16x32xf32> -> vector<64x32xf32>
    %9 = arith.mulf %8, %7 : vector<64x32xf32>
    %10 = arith.truncf %9 : vector<64x32xf32> to vector<64x32xbf16>
    %11 = arith.truncf %4 : vector<16x32xf32> to vector<16x32xbf16>
    %cst_11 = arith.constant dense<0.000000e+00> : vector<64x16xf32>
    %12 = tpu.matmul %10, %11, %cst_11 {dimension_numbers = #tpu.dot_dimension_numbers<[1], [1], [0], [0], [0, 0, 1, 0], [], []>} : vector<64x32xbf16>, vector<16x32xbf16>, vector<64x16xf32> -> vector<64x16xf32>
    %c0_12 = arith.constant 0 : index
    %c0_13 = arith.constant 0 : index
    %13 = vector.load %arg8[%c0_12, %c0_13] : memref<64x16xf32, #tpu.memory_space<vmem>>, vector<64x16xf32>
    %14 = arith.addf %12, %13 : vector<64x16xf32>
    %cst_14 = arith.constant dense<0xFF800000> : vector<64xf32>
    %15 = vector.multi_reduction <maximumf>, %14, %cst_14 [1] : vector<64x16xf32> to vector<64xf32>
    %16 = vector.shape_cast %15 : vector<64xf32> to vector<64x1xf32>
    %17 = vector.broadcast %16 : vector<64x1xf32> to vector<64x16xf32>
    %18 = arith.subf %14, %17 : vector<64x16xf32>
    %19 = math.exp %18 : vector<64x16xf32>
    %cst_15 = arith.constant dense<0.000000e+00> : vector<64xf32>
    %20 = vector.multi_reduction <add>, %19, %cst_15 [1] : vector<64x16xf32> to vector<64xf32>
    %21 = vector.shape_cast %20 : vector<64xf32> to vector<64x1xf32>
    %22 = tpu.reciprocal %21 {approx = true} : vector<64x1xf32> -> vector<64x1xf32>
    %23 = vector.broadcast %22 : vector<64x1xf32> to vector<64x16xf32>
    %24 = arith.mulf %19, %23 : vector<64x16xf32>
    %25 = arith.truncf %24 : vector<64x16xf32> to vector<64x16xbf16>
    %26 = arith.truncf %6 : vector<16x32xf32> to vector<16x32xbf16>
    %cst_16 = arith.constant dense<0.000000e+00> : vector<64x32xf32>
    %27 = tpu.matmul %25, %26, %cst_16 {dimension_numbers = #tpu.dot_dimension_numbers<[1], [0], [0], [1], [0, 0, 1, 1], [], []>} : vector<64x16xbf16>, vector<16x32xbf16>, vector<64x32xf32> -> vector<64x32xf32>
    %28 = arith.mulf %27, %7 : vector<64x32xf32>
    %29 = arith.truncf %28 : vector<64x32xf32> to vector<64x32xbf16>
    %c0_17 = arith.constant 0 : index
    %c0_18 = arith.constant 0 : index
    %30 = vector.load %arg5[%c0_17, %c0_18] : memref<32x32xbf16, #tpu.memory_space<vmem>>, vector<32x32xbf16>
    %cst_19 = arith.constant dense<0.000000e+00> : vector<64x32xf32>
    %31 = tpu.matmul %29, %30, %cst_19 {dimension_numbers = #tpu.dot_dimension_numbers<[1], [0], [0], [1], [0, 0, 1, 1], [], []>} : vector<64x32xbf16>, vector<32x32xbf16>, vector<64x32xf32> -> vector<64x32xf32>
    %32 = vector.extract_strided_slice %31 {offsets = [0, 0], sizes = [16, 32], strides = [1, 1]} : vector<64x32xf32> to vector<16x32xf32>
    %c0_20 = arith.constant 0 : index
    %c0_21 = arith.constant 0 : index
    %33 = vector.load %arg6[%c0_20, %c0_21] : memref<1x32xf32, #tpu.memory_space<vmem>>, vector<1x32xf32>
    %34 = vector.broadcast %33 : vector<1x32xf32> to vector<16x32xf32>
    %35 = arith.addf %32, %34 : vector<16x32xf32>
    %36 = vector.extract_strided_slice %31 {offsets = [16, 0], sizes = [16, 32], strides = [1, 1]} : vector<64x32xf32> to vector<16x32xf32>
    %37 = arith.addf %35, %36 : vector<16x32xf32>
    %38 = vector.extract_strided_slice %31 {offsets = [32, 0], sizes = [16, 32], strides = [1, 1]} : vector<64x32xf32> to vector<16x32xf32>
    %39 = arith.addf %37, %38 : vector<16x32xf32>
    %40 = vector.extract_strided_slice %31 {offsets = [48, 0], sizes = [16, 32], strides = [1, 1]} : vector<64x32xf32> to vector<16x32xf32>
    %41 = arith.addf %39, %40 : vector<16x32xf32>
    %c0_22 = arith.constant 0 : index
    %c0_23 = arith.constant 0 : index
    %42 = vector.load %arg9[%c0_22, %c0_23] : memref<16x32xf32, #tpu.memory_space<vmem>>, vector<16x32xf32>
    tpu.vector_store %arg9[%c0_22, %c0_23], %41 {strides = array<i32>} : memref<16x32xf32, #tpu.memory_space<vmem>>, vector<16x32xf32>,
    return
  }
  func.func @transform_0(%arg0: i32) -> (i32, i32) {
    %c0_i32 = arith.constant 0 : i32
    %c0_i32_0 = arith.constant 0 : i32
    %c0_i32_1 = arith.constant 0 : i32
    return %c0_i32, %c0_i32_0 : i32, i32
  }
  func.func @transform_1(%arg0: i32) -> (i32, i32) {
    %c0_i32 = arith.constant 0 : i32
    %c0_i32_0 = arith.constant 0 : i32
    %c0_i32_1 = arith.constant 0 : i32
    return %c0_i32, %c0_i32_0 : i32, i32
  }
  func.func @transform_2(%arg0: i32) -> (i32, i32) {
    %c0_i32 = arith.constant 0 : i32
    %c0_i32_0 = arith.constant 0 : i32
    %c0_i32_1 = arith.constant 0 : i32
    return %c0_i32, %c0_i32_0 : i32, i32
  }
  func.func @transform_3(%arg0: i32) -> (i32, i32) {
    %c0_i32 = arith.constant 0 : i32
    %c0_i32_0 = arith.constant 0 : i32
    %c0_i32_1 = arith.constant 0 : i32
    return %c0_i32, %c0_i32_0 : i32, i32
  }
  func.func @transform_4(%arg0: i32) -> (i32, i32) {
    %c0_i32 = arith.constant 0 : i32
    %c0_i32_0 = arith.constant 0 : i32
    %c0_i32_1 = arith.constant 0 : i32
    return %c0_i32, %c0_i32_0 : i32, i32
  }
  func.func @transform_5(%arg0: i32) -> (i32, i32) {
    %c0_i32 = arith.constant 0 : i32
    %c0_i32_0 = arith.constant 0 : i32
    %c0_i32_1 = arith.constant 0 : i32
    return %c0_i32, %c0_i32_0 : i32, i32
  }
  func.func @transform_6(%arg0: i32) -> (i32, i32) {
    %c0_i32 = arith.constant 0 : i32
    %c0_i32_0 = arith.constant 0 : i32
    %c0_i32_1 = arith.constant 0 : i32
    return %c0_i32, %c0_i32_0 : i32, i32
  }
  func.func @transform_7(%arg0: i32) -> (i32, i32) {
    %c0_i32 = arith.constant 0 : i32
    %c0_i32_0 = arith.constant 0 : i32
    %c0_i32_1 = arith.constant 0 : i32
    return %c0_i32, %c0_i32_0 : i32, i32
  }
  func.func @transform_8(%arg0: i32) -> (i32, i32) {
    %c0_i32 = arith.constant 0 : i32
    %c0_i32_0 = arith.constant 0 : i32
    %c0_i32_1 = arith.constant 0 : i32
    return %c0_i32, %c0_i32_0 : i32, i32
  }
}

</mosaic_0001>

<bundles_post_ra>
// kernel: attention_forward.1
= control target key start
LH: loop header
LB: loop body
LE: loop exit
PB: predicated region body
PF: predicated region fallthrough
CT: control target
= control target key end

     0   :  { %v808_v1 = vmov 0.0   ;;  %vm809_vm0 = vmmov 0   ;;  %vm54_vm1 = vcmask 261120   ;;  %s1015_s0 = inlined_call_operand.vmem [shape: bf16[16,32], index: 0, kind: input, shape index: {}]   ;;  %s1016_s1 = inlined_call_operand.vmem [shape: bf16[32,32], index: 1, kind: input, shape index: {}]   ;;  %s1017_s2 = inlined_call_operand.vmem [shape: bf16[32,32], index: 2, kind: input, shape index: {}]   ;;  %s1018_s3 = inlined_call_operand.vmem [shape: bf16[32,32], index: 3, kind: input, shape index: {}]   ;;  %s1019_s4 = inlined_call_operand.vmem [shape: bf16[32,32], index: 4, kind: input, shape index: {}]   ;;  %s1020_s5 = inlined_call_operand.vmem [shape: f32[1,32], index: 5, kind: input, shape index: {}]   ;;  %s1021_s6 = inlined_call_operand.vmem [shape: f32[64,32], index: 6, kind: input, shape index: {}]   ;;  %s1022_s7 = inlined_call_operand.vmem [shape: f32[64,16], index: 7, kind: input, shape index: {}]   ;;  %s1023_s8 = inlined_call_operand.hbm [shape: f32[16,32], index: 8, kind: output, shape index: {}]  }
   0x1   :  { %v743_v0 = vld [vmem:[%s1017_s2] sm:$0xff]   ;;  %689 = vmatprep.subr.bf16.mxu1 %v808_v1  ;;  %681 = vmatprep.subr.bf16.mxu0 %v808_v1  ;;  %v745_v3 = vld [vmem:[%s1017_s2 + $0x8] sm:$0xff]  }
   0x2   :  { %v744_v2 = vld [vmem:[%s1016_s1] sm:$0xff]   ;;  %690 = vmatpush3.bf16.msra.mxu1 %v743_v0  ;;  %693 = vmatprep.mubr.msk.bf16.mxu1 %vm809_vm0, %v808_v1  ;;  %v746_v4 = vld [vmem:[%s1016_s1 + $0x8] sm:$0xff]  }
   0x3   :  { %682 = vmatpush3.bf16.msra.mxu0 %v744_v2  ;;  %691 = vmatprep.subr.bf16.mxu1 %v808_v1  ;;  %v747_v5 = vld [vmem:[%s1015_s0] sm:$0xff]  }
   0x4   :  { %683 = vmatprep.subr.bf16.mxu0 %v808_v1  ;;  %685 = vmatprep.mubr.msk.bf16.mxu0 %vm809_vm0, %v808_v1 }
   0x6   :  { %692 = vmatpush3.bf16.msra.mxu1 %v745_v3 }
   0x7   :  { %684 = vmatpush3.bf16.msra.mxu0 %v746_v4 }
   0x8   :  { %13 = vsyncpa [#allocation3], 0  ;;  %697 = vmatprep.subr.bf16.mxu0 %v808_v1  ;;  %v878_v6 = vld [vmem:[%s1021_s6] sm:$0xff]  ;;  %v883_v7 = vld [vmem:[%s1021_s6 + $0x10] sm:$0xff]  ;;  %vm322_vm2 = vcmask 130048   ;;  %s810_s25 = smov [#allocation2]  }
   0x9   :  { %694 = vmatmul.mubr.msk.bf16.vlgmr.msra.gmra.mrb[0].mxu1 %vm54_vm1, %v747_v5  ;;  %v888_v8 = vld [vmem:[%s1021_s6 + $0x20] sm:$0xff]  ;;  %v893_v9 = vld [vmem:[%s1021_s6 + $0x30] sm:$0xff]  ;;  %v898_v11 = vld [vmem:[%s1021_s6 + $0x8] sm:$0xff]  ;;  %s620_s26 = sshll.u32 %s810_s25, 4  ;;  %s621_s26 = int_to_ptr.vmem [resolvable:$true] %s620_s26 }
   0xa   :  { %686 = vmatmul.mubr.msk.bf16.vlgmr.msra.gmra.mrb[0].mxu0 %vm54_vm1, %v747_v5  ;;  %v903_v14 = vld [vmem:[%s1021_s6 + $0x18] sm:$0xff]  ;;  %v908_v15 = vld [vmem:[%s1021_s6 + $0x28] sm:$0xff]  ;;  %v748_v36 = vld [vmem:[%s1018_s3] sm:$0xff]   ;;  %p789_p1 = scmp.lt.s32.totalorder %s621_s26, %s621_s26 }
   0xb   :  { %701 = vmatprep.mubr.msk.bf16.mxu0 %vm809_vm0, %v808_v1  ;;  %v913_v16 = vld [vmem:[%s1021_s6 + $0x38] sm:$0xff]  ;;  %698 = vmatpush3.bf16.msra.mxu0 %v748_v36  ;;  %v749_v37 = vld [vmem:[%s1018_s3 + $0x8] sm:$0xff]   ;;  %v236_v38 = vld [vmem:[%s1022_s7 + $0x10] sm:$0xff] }
   0xc   :  { %699 = vmatprep.subr.bf16.mxu0 %v808_v1  ;;  %v234_v39 = vld [vmem:[%s1022_s7] sm:$0xff]  ;;  %v237_v41 = vld [vmem:[%s1022_s7 + $0x18] sm:$0xff]  ;;  %v235_v44 = vld [vmem:[%s1022_s7 + $0x8] sm:$0xff] }
   0xd   :  { %v238_v53 = vld [vmem:[%s1022_s7 + $0x20] sm:$0xff]  ;;  %v240_v56 = vld [vmem:[%s1022_s7 + $0x30] sm:$0xff]  ;;  %v239_v58 = vld [vmem:[%s1022_s7 + $0x28] sm:$0xff] }
   0xe   :  { %v241_v61 = vld [vmem:[%s1022_s7 + $0x38] sm:$0xff] }
   0xf   :  { %700 = vmatpush3.bf16.msra.mxu0 %v749_v37 }
  0x12   :  { %702 = vmatmul.mubr.msk.bf16.vlgmr.msra.gmra.mrb[4].mxu0 %vm54_vm1, %v747_v5 }
  0xdc   :  { %v149_v10 = vpop.f32.mrb[0].mxu1 }
  0xdd   :  { %v695_v12 = vpop.f32.mrb[1].mxu1  ;;  %v92_v13 = vpop.f32.mrb[0].mxu0 }
  0xde   :  { %v152_v17 = vpop.f32.mrb[2].mxu1  ;;  %v221_v18 = vmul.f32 %v878_v6, %v92_v13  ;;  %v223_v19 = vmul.f32 %v883_v7, %v92_v13  ;;  %v225_v20 = vmul.f32 %v888_v8, %v92_v13  ;;  %v227_v21 = vmul.f32 %v893_v9, %v92_v13  ;;  %v687_v22 = vpop.f32.mrb[1].mxu0 }
  0xdf   :  { %v233_v23 = vpack.c.bf16 %v152_v17, %v149_v10  ;;  %v696_v24 = vpop.f32.mrb[3].mxu1  ;;  %v95_v25 = vpop.f32.mrb[2].mxu0 }
  0xe0   :  { %v222_v26 = vmul.f32 %v898_v11, %v95_v25  ;;  %v224_v27 = vmul.f32 %v903_v14, %v95_v25  ;;  %v226_v28 = vmul.f32 %v908_v15, %v95_v25  ;;  %v228_v29 = vmul.f32 %v913_v16, %v95_v25  ;;  %v688_v30 = vpop.f32.mrb[3].mxu0 }
  0xe1   :  { %v255_v31 = vsel %vm54_vm1, %v233_v23, 0  ;;  %737 = vmatprep.subr.msk.bf16.mxu1 %vm54_vm1, %v233_v23 }
  0xe2   :  { %v230_v32 = vpack.c.bf16 %v224_v27, %v223_v19  ;;  %706 = vmatpush3.bf16.xpose.msra.mxu1 %v255_v31  ;;  %v229_v33 = vpack.c.bf16 %v222_v26, %v221_v18  ;;  %v231_v34 = vpack.c.bf16 %v226_v28, %v225_v20  ;;  %v232_v35 = vpack.c.bf16 %v228_v29, %v227_v21 }
  0xe4   :  { %707 = vmatprep.mubr.msk.bf16.mxu1 %vm54_vm1, %v229_v33 }
  0xe9   :  { %708 = vmatmul.mubr.msk.bf16.vlgmr.msra.gmra.mrb[4].mxu1 %vm54_vm1, %v230_v32 }
  0xea   :  { %711 = vmatprep.mubr.msk.bf16.mxu1 %vm54_vm1, %v231_v34 }
  0xf1   :  { %712 = vmatmul.mubr.msk.bf16.gmra.mrb[8].mxu1 %vm54_vm1, %v232_v35 }
 0x1bc   :  { %v709_v40 = vpop.f32.mrb[4].mxu1 }
 0x1bd   :  { %v300_v42 = vadd.f32 %v709_v40, %v236_v38  ;;  %v291_v43 = vpop.f32.mrb[5].mxu1 }
 0x1be   :  { %v292_v45 = vadd.f32 %v291_v43, %v234_v39  ;;  %v710_v46 = vpop.f32.mrb[6].mxu1 }
 0x1bf   :  { %v303_v47 = vadd.f32 %v710_v46, %v237_v41  ;;  %v294_v48 = vpop.f32.mrb[7].mxu1  ;;  %v329_v49 = vsel %vm322_vm2, %v300_v42, -inf }
 0x1c0   :  { %v295_v50 = vadd.f32 %v294_v48, %v235_v44  ;;  %330 = vmax.xlane.f32.xlu1 %v329_v49  ;;  %v323_v51 = vsel %vm322_vm2, %v292_v45, -inf }
 0x1c1   :  { %324 = vmax.xlane.f32.xlu0 %v323_v51  ;;  %v332_v52 = vsel %vm322_vm2, %v303_v47, -inf }
 0x1c2   :  { %v326_v55 = vsel %vm322_vm2, %v295_v50, -inf }
 0x1c4   :  { %333 = vmax.xlane.f32.xlu1 %v332_v52  ;;  %v713_v54 = vpop.f32.mrb[8].mxu1 }
 0x1c5   :  { %v307_v57 = vpop.f32.mrb[9].mxu1  ;;  %327 = vmax.xlane.f32.xlu0 %v326_v55  ;;  %v316_v63 = vadd.f32 %v713_v54, %v240_v56  ;;  %v206_v54 = vpop.f32.mrb[4].mxu0 }
 0x1c6   :  { %v308_v59 = vadd.f32 %v307_v57, %v238_v53  ;;  %v714_v60 = vpop.f32.mrb[10].mxu1  ;;  %v703_v55 = vpop.f32.mrb[5].mxu0 }
 0x1c7   :  { %v310_v62 = vpop.f32.mrb[11].mxu1  ;;  %v319_v2 = vadd.f32 %v714_v60, %v241_v61  ;;  %v341_v4 = vsel %vm322_vm2, %v316_v63, -inf  ;;  %v209_v56 = vpop.f32.mrb[6].mxu0 }
 0x1c8   :  { %v311_v0 = vadd.f32 %v310_v62, %v239_v58  ;;  %v335_v1 = vsel %vm322_vm2, %v308_v59, -inf  ;;  %v415_v57 = vpack.c.bf16 %v209_v56, %v206_v54  ;;  %v704_v58 = vpop.f32.mrb[7].mxu0 }
 0x1c9   :  { %336 = vmax.xlane.f32.xlu0 %v335_v1  ;;  %v344_v5 = vsel %vm322_vm2, %v319_v2, -inf }
 0x1ca   :  { %v338_v3 = vsel %vm322_vm2, %v311_v0, -inf  ;;  %715 = vmatprep.subr.bf16.mxu0 %v415_v57 }
 0x1cb   :  { %339 = vmax.xlane.f32.xlu1 %v338_v3  ;;  %716 = vmatpush3.bf16.msra.mxu0 %v415_v57 }
 0x1cd   :  { %342 = vmax.xlane.f32.xlu0 %v341_v4 }
 0x1cf   :  { %345 = vmax.xlane.f32.xlu1 %v344_v5 }
 0x24d   :  { %v331_v10 = vpop.xlane.xlu1 %330 }
 0x24e   :  { %v349_v12 = vsub.f32 %v300_v42, %v331_v10  ;;  %v325_v13 = vpop.xlane.xlu0 %324 }
 0x24f   :  { %v347_v17 = vsub.f32 %v292_v45, %v325_v13 }
 0x250   :  { %v359_v18 = vmul.f32 1.442695, %v349_v12 }
 0x251   :  { %v355_v19 = vmul.f32 1.442695, %v347_v17  ;;  %v334_v20 = vpop.xlane.xlu1 %333 }
 0x252   :  { %v350_v21 = vsub.f32 %v303_v47, %v334_v20  ;;  %v328_v22 = vpop.xlane.xlu0 %327 }
 0x253   :  { %752 = vpow2.f32 %v355_v19  ;;  %v348_v23 = vsub.f32 %v295_v50, %v328_v22 }
 0x254   :  { %754 = vpow2.f32 %v359_v18  ;;  %v361_v24 = vmul.f32 1.442695, %v350_v21 }
 0x255   :  { %v357_v25 = vmul.f32 1.442695, %v348_v23 }
 0x256   :  { %v337_v26 = vpop.xlane.xlu0 %336 }
 0x257   :  { %756 = vpow2.f32 %v357_v25  ;;  %v351_v27 = vsub.f32 %v308_v59, %v337_v26  ;;  %v750_v59 = vld [vmem:[%s1019_s4] sm:$0xff]  }
 0x258   :  { %v340_v28 = vpop.xlane.xlu1 %339  ;;  %758 = vpow2.f32 %v361_v24  ;;  %725 = vmatprep.subr.bf16.mxu1 %v750_v59 }
 0x259   :  { %v363_v29 = vmul.f32 1.442695, %v351_v27  ;;  %v352_v30 = vsub.f32 %v311_v0, %v340_v28  ;;  %726 = vmatpush3.bf16.msra.mxu1 %v750_v59 }
 0x25a   :  { %v343_v31 = vpop.xlane.xlu0 %342 }
 0x25b   :  { %760 = vpow2.f32 %v363_v29  ;;  %v365_v32 = vmul.f32 1.442695, %v352_v30  ;;  %v353_v33 = vsub.f32 %v316_v63, %v343_v31 }
 0x25c   :  { %v346_v34 = vpop.xlane.xlu1 %345 }
 0x25d   :  { %v753_v35 = vpop.eup %752  ;;  %762 = vpow2.f32 %v365_v32  ;;  %v367_v36 = vmul.f32 1.442695, %v353_v33  ;;  %v354_v37 = vsub.f32 %v319_v2, %v346_v34  ;;  %v751_v32 = vld [vmem:[%s1019_s4 + $0x8] sm:$0xff]  }
 0x25e   :  { %v371_v38 = vsel %vm322_vm2, %v753_v35, 0.0  ;;  %v755_v39 = vpop.eup %754  ;;  %727 = vmatprep.subr.bf16.mxu1 %v751_v32 }
 0x25f   :  { %764 = vpow2.f32 %v367_v36  ;;  %v369_v40 = vmul.f32 1.442695, %v354_v37  ;;  %372 = vadd.xlane.f32.xlu0 %v371_v38  ;;  %v377_v42 = vsel %vm322_vm2, %v755_v39, 0.0  ;;  %728 = vmatpush3.bf16.msra.mxu1 %v751_v32 }
 0x261   :  { %v757_v41 = vpop.eup %756  ;;  %766 = vpow2.f32 %v369_v40 }
 0x262   :  { %v374_v43 = vsel %vm322_vm2, %v757_v41, 0.0  ;;  %v759_v44 = vpop.eup %758 }
 0x263   :  { %378 = vadd.xlane.f32.xlu0 %v377_v42  ;;  %375 = vadd.xlane.f32.xlu1 %v374_v43  ;;  %v380_v46 = vsel %vm322_vm2, %v759_v44, 0.0 }
 0x265   :  { %v761_v45 = vpop.eup %760 }
 0x266   :  { %v383_v47 = vsel %vm322_vm2, %v761_v45, 0.0 }
 0x267   :  { %v763_v48 = vpop.eup %762  ;;  %381 = vadd.xlane.f32.xlu1 %v380_v46  ;;  %384 = vadd.xlane.f32.xlu0 %v383_v47 }
 0x268   :  { %v386_v50 = vsel %vm322_vm2, %v763_v48, 0.0 }
 0x269   :  { %v765_v49 = vpop.eup %764 }
 0x26a   :  { %v389_v51 = vsel %vm322_vm2, %v765_v49, 0.0 }
 0x26b   :  { %v767_v52 = vpop.eup %766  ;;  %387 = vadd.xlane.f32.xlu1 %v386_v50  ;;  %390 = vadd.xlane.f32.xlu0 %v389_v51 }
 0x26c   :  { %v392_v53 = vsel %vm322_vm2, %v767_v52, 0.0 }
 0x26f   :  { %393 = vadd.xlane.f32.xlu1 %v392_v53 }
 0x2ec   :  { %v373_v60 = vpop.xlane.xlu0 %372 }
 0x2ed   :  { %768 = vrcp.f32 %v373_v60 }
 0x2f0   :  { %v376_v61 = vpop.xlane.xlu1 %375  ;;  %v379_v62 = vpop.xlane.xlu0 %378 }
 0x2f1   :  { %770 = vrcp.f32 %v376_v61 }
 0x2f2   :  { %772 = vrcp.f32 %v379_v62 }
 0x2f4   :  { %v382_v63 = vpop.xlane.xlu1 %381  ;;  %v385_v0 = vpop.xlane.xlu0 %384 }
 0x2f5   :  { %774 = vrcp.f32 %v382_v63 }
 0x2f6   :  { %776 = vrcp.f32 %v385_v0 }
 0x2f7   :  { %v769_v3 = vpop.eup %768 }
 0x2f8   :  { %v388_v1 = vpop.xlane.xlu1 %387  ;;  %v391_v2 = vpop.xlane.xlu0 %390  ;;  %v403_v10 = vmul.f32 %v769_v3, %v753_v35 }
 0x2f9   :  { %778 = vrcp.f32 %v388_v1 }
 0x2fa   :  { %780 = vrcp.f32 %v391_v2 }
 0x2fb   :  { %v771_v4 = vpop.eup %770 }
 0x2fc   :  { %v394_v5 = vpop.xlane.xlu1 %393  ;;  %v404_v12 = vmul.f32 %v771_v4, %v757_v41  ;;  %v773_v13 = vpop.eup %772 }
 0x2fd   :  { %782 = vrcp.f32 %v394_v5  ;;  %v405_v19 = vmul.f32 %v773_v13, %v755_v39 }
 0x2fe   :  { %v411_v17 = vpack.c.bf16 %v404_v12, %v403_v10 }
 0x2ff   :  { %v775_v18 = vpop.eup %774 }
 0x300   :  { %v406_v20 = vmul.f32 %v775_v18, %v759_v44  ;;  %717 = vmatprep.mubr.msk.bf16.mxu0 %vm322_vm2, %v411_v17  ;;  %v777_v21 = vpop.eup %776 }
 0x301   :  { %v407_v24 = vmul.f32 %v777_v21, %v761_v45 }
 0x302   :  { %v412_v22 = vpack.c.bf16 %v406_v20, %v405_v19 }
 0x303   :  { %v779_v23 = vpop.eup %778 }
 0x304   :  { %718 = vmatmul.mubr.msk.bf16.vlgmr.msra.gmra.mrb[8].mxu0 %vm322_vm2, %v412_v22  ;;  %v408_v25 = vmul.f32 %v779_v23, %v763_v48  ;;  %v781_v26 = vpop.eup %780 }
 0x305   :  { %v409_v29 = vmul.f32 %v781_v26, %v765_v49  ;;  %v655_v49 = vld [vmem:[%s1020_s5] ss:$0 sm:$0xff]  ;;  %s784_s5 = scalar_lea.vmem %s621_s26, 256 }
 0x306   :  { %v413_v27 = vpack.c.bf16 %v408_v25, %v407_v24  ;;  %p785_p0 = scmp.ne.s32.totalorder %s621_s26, %s784_s5  ;;  %p790_p2 = scmp.lt.s32.totalorder %s784_s5, %s784_s5 }
 0x307   :  { %v783_v28 = vpop.eup %782 }
 0x308   :  { %721 = vmatprep.mubr.msk.bf16.mxu0 %vm322_vm2, %v413_v27  ;;  %v410_v30 = vmul.f32 %v783_v28, %v767_v52  ;;  %p791_p3 = por %p790_p2, %p789_p1 }
 0x30a   :  { %v414_v31 = vpack.c.bf16 %v410_v30, %v409_v29  ;;  %p792_p4 = pnand %p791_p3, %p785_p0 }
 0x30c   :  { %722 = vmatmul.mubr.msk.bf16.gmra.mrb[12].mxu0 %vm322_vm2, %v414_v31 }
 0x3d7   :  { %v719_v33 = vpop.f32.mrb[8].mxu0 }
 0x3d8   :  { %v462_v34 = vpop.f32.mrb[9].mxu0  ;;  %v495_v36 = vmul.f32 %v719_v33, %v883_v7 }
 0x3d9   :  { %v720_v35 = vpop.f32.mrb[10].mxu0  ;;  %v493_v39 = vmul.f32 %v462_v34, %v878_v6 }
 0x3da   :  { %v496_v37 = vmul.f32 %v720_v35, %v903_v14  ;;  %v465_v38 = vpop.f32.mrb[11].mxu0 }
 0x3db   :  { %v494_v40 = vmul.f32 %v465_v38, %v898_v11 }
 0x3dc   :  { %v502_v41 = vpack.c.bf16 %v496_v37, %v495_v36 }
 0x3dd   :  { %v501_v42 = vpack.c.bf16 %v494_v40, %v493_v39 }
 0x3df   :  { %v723_v43 = vpop.f32.mrb[12].mxu0  ;;  %729 = vmatprep.mubr.msk.bf16.mxu1 %vm54_vm1, %v501_v42 }
 0x3e0   :  { %v478_v44 = vpop.f32.mrb[13].mxu0  ;;  %730 = vmatmul.mubr.msk.bf16.vlgmr.msra.gmra.mrb[12].mxu1 %vm54_vm1, %v502_v41  ;;  %v499_v46 = vmul.f32 %v723_v43, %v893_v9 }
 0x3e1   :  { %v724_v45 = vpop.f32.mrb[14].mxu0  ;;  %v497_v14 = vmul.f32 %v478_v44, %v888_v8 }
 0x3e2   :  { %v500_v7 = vmul.f32 %v724_v45, %v913_v16  ;;  %v481_v47 = vpop.f32.mrb[15].mxu0 }
 0x3e3   :  { %v498_v6 = vmul.f32 %v481_v47, %v908_v15 }
 0x3e4   :  { %v504_v48 = vpack.c.bf16 %v500_v7, %v499_v46 }
 0x3e5   :  { %v503_v11 = vpack.c.bf16 %v498_v6, %v497_v14 }
 0x3e7   :  { %733 = vmatprep.mubr.msk.bf16.mxu1 %vm54_vm1, %v503_v11 }
 0x3e8   :  { %734 = vmatmul.mubr.msk.bf16.gmra.mrb[16].mxu1 %vm54_vm1, %v504_v48 }
 0x4b3   :  { %v731_v50 = vpop.f32.mrb[12].mxu1 }
 0x4b4   :  { %v567_v51 = vpop.f32.mrb[13].mxu1 }
 0x4b5   :  { %v605_v9 = vadd.f32 %v655_v49, %v567_v51  ;;  %v732_v52 = vpop.f32.mrb[14].mxu1 }
 0x4b6   :  { %v570_v16 = vpop.f32.mrb[15].mxu1 }
 0x4b7   :  { %v606_v53 = vadd.f32 %v655_v49, %v570_v16  ;;  %v607_v54 = vadd.f32 %v731_v50, %v605_v9 }
 0x4b9   :  { %v608_v8 = vadd.f32 %v732_v52, %v606_v53 }
 0x4bb   :  { %v735_v55 = vpop.f32.mrb[16].mxu1 }
 0x4bc   :  { %v583_v15 = vpop.f32.mrb[17].mxu1 }
 0x4bd   :  { %v609_v56 = vadd.f32 %v607_v54, %v583_v15  ;;  %v736_v57 = vpop.f32.mrb[18].mxu1 }
 0x4be   :  { %v586_v58 = vpop.f32.mrb[19].mxu1 }
 0x4bf   :  { %v611_v59 = vadd.f32 %v735_v55, %v609_v56  ;;  %v610_v60 = vadd.f32 %v608_v8, %v586_v58 }
 0x4c1   :  { %613 = vst.msk [vmem:[#allocation2] sm:$0xff] %vm54_vm1, %v611_v59  ;;  %v612_v61 = vadd.f32 %v736_v57, %v610_v60 }
 0x4c3   :  { %614 = vst.msk [vmem:[#allocation2 + $0x8] sm:$0xff] %vm54_vm1, %v612_v61 }
 0x4c4   :  { %795 = shalt.err (!%p792_p4)
}
 0x4c5   :  { %s796_s28 = scalar_lea.hbm %s1023_s8, 256 }
 0x4c6   :  { %p797_p5 = scmp.ne.s32.totalorder %s1023_s8, %s796_s28  ;;  %p800_p6 = scmp.lt.u32.totalorder %s796_s28, %s1023_s8 }
 0x4c8   :  { %p802_p7 = pnand %p800_p6, %p797_p5 }
 0x4ca   :  { %805 = shalt.err (!%p802_p7)
}
 0x4cb   :  { %s811_s11 = smov 128   ;;  %s812_s12 = smov 8  }
 0x4cc   :  { %626 = dma.vmem_to_hbm [thread:$0]  %s621_s26, 256, %s1023_s8, [#allocation3], %s811_s11, %s811_s11, %s812_s12  }
 0x4cd   :  { %806 = dma.done.wait [#allocation3], 256  }
 0x4ce   :  { %807 = vsyncadd [#allocation3], 4294967040 }
 0x4cf   :  { %630 = vsyncpa [#allocation3], 1 }

</bundles_post_ra>
